<compile_context>
chip_gen: v6e
topology: v6e:2x2x1
jax: 0.10.0
libtpu: 0.0.40
codegen_flags: <defaults>
</compile_context>

<pallas_src>
import numpy as np

import jax
import jax.numpy as jnp
from jax.experimental import pallas as pl
from jax.experimental.pallas import tpu as pltpu


# ----------------------------------------------------------------------------
# Main Pallas kernel: conv + bias + ReLU + sign-selected height-pool + BN stats
# ----------------------------------------------------------------------------
def _make_conv_block_kernel(*, h, k_h, k_w, tw, w_out, n_chan):
    h_out = h - k_h + 1

    def _finalize(t, sgn, m, s, ss, out_ref, s_ref, ss_ref):
        # Mask right-padded time columns for the BN batch statistics.
        lane = jax.lax.broadcasted_iota(jnp.int32, (1, tw), 1)
        valid = ((t * tw + lane) < w_out).astype(jnp.float32)          # (1, tw)
        out_ref[...] = sgn * m                                         # (C, tw) lane-dense
        s_ref[...] = jnp.sum(s * valid, axis=1, keepdims=True)         # (C, 1)
        ss_ref[...] = jnp.sum(ss * valid, axis=1, keepdims=True)

    def _init(dtype=jnp.float32):
        return (jnp.full((n_chan, tw), -jnp.inf, dtype),
                jnp.zeros((n_chan, tw), dtype),
                jnp.zeros((n_chan, tw), dtype))

    if k_h > 1:
        # Timbral block: ONE MXU matmul per tile (block-banded weight slab), then a
        # single fused pass over the h_out result rows.
        def kernel(x_ref, w_ref, b_ref, sgn_ref, out_ref, s_ref, ss_ref, y_scr):
            # x_ref : (h, tw + k_w - 1) bf16 -- one batch element, one time tile (+halo)
            # w_ref : (h_out*C, k_w*h) bf16  -- block-banded slab, resident across grid
            # b_ref / sgn_ref : (C, 1) f32   -- bias, sign(gamma) (+1 / -1)
            # out_ref : (C, tw) f32          -- pre-BN pooled output (max or min by sign)
            # s_ref / ss_ref : (C, 1) f32    -- per-tile BN sum / sum-of-squares
            # y_scr : (h_out*C, tw) f32 VMEM scratch for the matmul result
            t = pl.program_id(1)
            x = x_ref[...]
            s_mat = jnp.concatenate([x[:, dw:dw + tw] for dw in range(k_w)], axis=0)
            y_scr[...] = jnp.dot(w_ref[...], s_mat,
                                 preferred_element_type=jnp.float32)   # (h_out*C, tw)
            b = b_ref[...]
            sgn = sgn_ref[...]

            def body(r, carry):
                m, s, ss = carry
                r0 = pl.multiple_of(r * n_chan, n_chan)
                row = jnp.maximum(y_scr[pl.ds(r0, n_chan), :] + b, 0.0)  # (C, tw)
                return (jnp.maximum(m, sgn * row), s + row, ss + row * row)

            m, s, ss = jax.lax.fori_loop(0, h_out, body, _init(), unroll=True)
            _finalize(t, sgn, m, s, ss, out_ref, s_ref, ss_ref)
    else:
        # Temporal block (k_h == 1, tiny K and C): per-row VPU FMAs; no (h, C, tw)
        # intermediate is ever built.
        def kernel(x_ref, w_ref, b_ref, sgn_ref, out_ref, s_ref, ss_ref):
            t = pl.program_id(1)
            w2 = w_ref[...].astype(jnp.float32)                        # (C, k_w)
            b = b_ref[...]
            sgn = sgn_ref[...]

            def body(r, carry):
                m, s, ss = carry
                xr = x_ref[pl.ds(r, 1), :].astype(jnp.float32)          # (1, tw+k_w-1)
                acc = jnp.zeros((n_chan, tw), jnp.float32)
                for dw in range(k_w):                                   # k_w fused FMAs
                    acc = acc + w2[:, dw:dw + 1] * xr[:, dw:dw + tw]
                row = jnp.maximum(acc + b, 0.0)                          # (C, tw)
                return (jnp.maximum(m, sgn * row), s + row, ss + row * row)

            m, s, ss = jax.lax.fori_loop(0, h, body, _init(), unroll=True)
            _finalize(t, sgn, m, s, ss, out_ref, s_ref, ss_ref)

    return kernel


def conv_block_forward(x_framed, w_mat, b, sgn, *, h, k_h, k_w, tw, w_out, n_chan,
                       vmem_limit_bytes=64 * 1024 * 1024):
    """x_framed: (N, T, h, tw+k_w-1) bf16.  Returns (picked_pooled, sum, sumsq)."""
    n, t_tiles, h_in, twh = x_framed.shape
    assert h_in == h and twh == tw + k_w - 1
    h_out = h - k_h + 1
    kernel = _make_conv_block_kernel(h=h, k_h=k_h, k_w=k_w, tw=tw,
                                     w_out=w_out, n_chan=n_chan)
    out_shape = (
        # Pre-BN pooled output directly in the final (N, C, T*tw) layout.
        jax.ShapeDtypeStruct((n, n_chan, t_tiles * tw), jnp.float32),
        jax.ShapeDtypeStruct((n, t_tiles, n_chan, 1), jnp.float32),    # BN sum
        jax.ShapeDtypeStruct((n, t_tiles, n_chan, 1), jnp.float32),    # BN sumsq
    )
    in_specs = [
        pl.BlockSpec((None, None, h, twh), lambda i, t: (i, t, 0, 0)),
        pl.BlockSpec(w_mat.shape, lambda i, t: (0, 0)),   # resident across the grid
        pl.BlockSpec(b.shape, lambda i, t: (0, 0)),
        pl.BlockSpec(sgn.shape, lambda i, t: (0, 0)),
    ]
    out_specs = (
        pl.BlockSpec((None, n_chan, tw), lambda i, t: (i, 0, t)),      # lane-dense
        pl.BlockSpec((None, None, n_chan, 1), lambda i, t: (i, t, 0, 0)),
        pl.BlockSpec((None, None, n_chan, 1), lambda i, t: (i, t, 0, 0)),
    )
    scratch_shapes = (
        [pltpu.VMEM((h_out * n_chan, tw), jnp.float32)] if k_h > 1 else [])
    return pl.pallas_call(
        kernel,
        grid=(n, t_tiles),
        out_shape=out_shape,
        in_specs=in_specs,
        out_specs=out_specs,
        scratch_shapes=scratch_shapes,
        compiler_params=pltpu.CompilerParams(
            dimension_semantics=("parallel", "parallel"),
            vmem_limit_bytes=vmem_limit_bytes),
    )(x_framed, w_mat, b, sgn)


# ----------------------------------------------------------------------------
# Parameter init (Conv2d/BatchNorm2d-style) and host-side weight slab
# ----------------------------------------------------------------------------
def _build_wbig(w_np, h):
    """Block-banded (h_out*C, k_w*h) slab: one matmul computes all conv rows."""
    c, k_h, k_w = w_np.shape
    h_out = h - k_h + 1
    wbig = np.zeros((h_out, c, k_w, h), np.float32)
    for i in range(h_out):
        for dh in range(k_h):
            wbig[i, :, :, i + dh] = w_np[:, dh, :]          # (C, k_w)
    return wbig.reshape(h_out * c, k_w * h)


def _init_block(key, y_dim, k_h, k_w, pad_w, n_chan):
    fan_in = 1 * k_h * k_w
    bound = 1.0 / float(np.sqrt(fan_in))
    kw_, kb_ = jax.random.split(key)
    w = jax.random.uniform(kw_, (n_chan, k_h, k_w), jnp.float32, -bound, bound)
    w = w.astype(jnp.bfloat16).astype(jnp.float32)          # matmul operands are bf16
    b = jax.random.uniform(kb_, (n_chan, 1), jnp.float32, -bound, bound)
    gamma = jnp.ones((n_chan,), jnp.float32)                # BatchNorm2d default init
    beta = jnp.zeros((n_chan,), jnp.float32)
    if k_h > 1:
        w_mat = jnp.asarray(_build_wbig(np.asarray(w), y_dim), jnp.bfloat16)
    else:
        w_mat = w.reshape(n_chan, k_w)                      # f32; VPU path
    return dict(k_h=k_h, k_w=k_w, pad_w=pad_w, C=n_chan,
                w=w, b=b, gamma=gamma, beta=beta, w_mat=w_mat)


def init_frontend(key, y_input_dim, timbral_k_height, temporal_k_width, filter_factor):
    if not isinstance(timbral_k_height, (list, tuple)):
        timbral_k_height = [timbral_k_height]
    if not isinstance(temporal_k_width, (list, tuple)):
        temporal_k_width = [temporal_k_width]
    k_hs = [int(y_input_dim * k) for k in timbral_k_height]
    keys = jax.random.split(key, len(k_hs) + len(temporal_k_width))
    blocks, i = [], 0
    for k_h in k_hs:                     # timbral: kernel (k_h, 8), padding (0, 3)
        blocks.append(_init_block(keys[i], y_input_dim, k_h, 8, 3,
                                  int(filter_factor * 128)))
        i += 1
    for k_w in temporal_k_width:         # temporal: kernel (1, k_w), padding (0, (k_w-1)//2)
        blocks.append(_init_block(keys[i], y_input_dim, 1, k_w, (k_w - 1) // 2,
                                  int(filter_factor * 32)))
        i += 1
    return {"blocks": blocks, "y_input_dim": y_input_dim}


# ----------------------------------------------------------------------------
# Forward
# ----------------------------------------------------------------------------
def frontend_forward(params, x, *, eps=1e-5, time_tile=512):
    """x: (N, 1, H, W) NCHW with C=1.  Matches torch.squeeze(cat(out, dim=1))."""
    assert time_tile % 128 == 0
    x_nhw = x[:, 0, :, :]
    n, h, w = x_nhw.shape
    outs, w_outs = [], []
    for blk in params["blocks"]:
        k_h, k_w, pad_w, c = blk["k_h"], blk["k_w"], blk["pad_w"], blk["C"]
        h_out = h - k_h + 1
        w_out = w + 2 * pad_w - k_w + 1
        w_outs.append(w_out)
        # Lane-dense tile width: multiple of 128 (time_tile default 512 is also a
        # multiple of 256 for the v6e/v7x 2x256^2 MXU).  Last tile is zero padded.
        tw = min(pl.cdiv(w_out, 128) * 128, time_tile)
        t_tiles = pl.cdiv(w_out, tw)

        # Frame the zero-padded input into overlapping time tiles (halo = k_w-1 cols
        # only); the single-channel input is tiny so the extra HBM pass is cheap.
        xp = jnp.pad(x_nhw, ((0, 0), (0, 0), (pad_w, pad_w))).astype(jnp.bfloat16)
        full_w = t_tiles * tw + k_w - 1
        xp = jnp.pad(xp, ((0, 0), (0, 0), (0, full_w - xp.shape[-1])))
        x_framed = jnp.stack(
            [xp[:, :, t * tw: t * tw + tw + k_w - 1] for t in range(t_tiles)], axis=1)

        # Sign of gamma selects max vs min of the pre-BN pooled value in-kernel
        # (rsqrt(var+eps) > 0, so sign(scale) == sign(gamma); >= 0 convention).
        sgn = jnp.where(blk["gamma"] >= 0.0, 1.0, -1.0).reshape(c, 1).astype(jnp.float32)

        picked, s_o, ss_o = conv_block_forward(
            x_framed, blk["w_mat"], blk["b"], sgn,
            h=h, k_h=k_h, k_w=k_w, tw=tw, w_out=w_out, n_chan=c)

        # Combine per-tile BN statistics (training-mode batch stats, biased var).
        # Single-pass E[y^2]-E[y]^2 in f32, clamped at 0 (fine at these magnitudes).
        count = float(n * h_out * w_out)
        s_tot = jnp.sum(s_o, axis=(0, 1))[:, 0]
        ss_tot = jnp.sum(ss_o, axis=(0, 1))[:, 0]
        mean = s_tot / count
        var = jnp.maximum(ss_tot / count - mean * mean, 0.0)
        scale = jax.lax.rsqrt(var + eps) * blk["gamma"]
        shift = blk["beta"] - mean * scale

        # Per-channel BN affine on the already-pooled output: trivially XLA-fused
        # elementwise epilogue (replaces the old whole-array-VMEM finalize kernel).
        pooled = picked[:, :, :w_out]                              # (N, C, W_out)
        outs.append(pooled * scale[None, :, None] + shift[None, :, None])

    assert len(set(w_outs)) == 1, "conv blocks must agree on W_out for cat(dim=1)"
    out = jnp.concatenate(outs, axis=1)                            # (N, C_tot, W_out)
    # torch.squeeze also drops the batch dim when N == 1 (kept for parity).
    return jnp.squeeze(out)


# ----------------------------------------------------------------------------
# Pure-JAX reference (correctness check only; uses the same bf16-rounded inputs)
# ----------------------------------------------------------------------------
def frontend_reference(params, x, eps=1e-5):
    xb = x.astype(jnp.bfloat16).astype(jnp.float32)
    outs = []
    for blk in params["blocks"]:
        c, pad_w = blk["C"], blk["pad_w"]
        w4 = blk["w"][:, None, :, :]                       # (C, 1, k_h, k_w)
        conv = jax.lax.conv_general_dilated(
            xb, w4, window_strides=(1, 1),
            padding=((0, 0), (pad_w, pad_w)),
            dimension_numbers=("NCHW", "OIHW", "NCHW"),
            precision=jax.lax.Precision.HIGHEST)
        conv = jnp.maximum(conv + blk["b"].reshape(1, c, 1, 1), 0.0)
        mean = jnp.mean(conv, axis=(0, 2, 3), keepdims=True)
        var = jnp.mean((conv - mean) ** 2, axis=(0, 2, 3), keepdims=True)
        bn = (conv - mean) * jax.lax.rsqrt(var + eps) * blk["gamma"].reshape(1, c, 1, 1) \
             + blk["beta"].reshape(1, c, 1, 1)
        outs.append(jnp.max(bn, axis=2))                   # MaxPool over full height
    return jnp.squeeze(jnp.concatenate(outs, axis=1))


# ----------------------------------------------------------------------------
if __name__ == "__main__":
    key = jax.random.PRNGKey(0)
    k_params, k_x = jax.random.split(key)

    # Small shapes: batch=2, y_input_dim (freq bins)=16, time frames=16.
    N, H, W = 2, 16, 16
    y_input_dim = H
    timbral_k_height = 0.5    # -> k_h = 8  (timbral conv kernel (8, 8), pad (0, 3))
    temporal_k_width = 8      # even width so both branches give W-1 frames (cat-compatible)
    filter_factor = 0.25      # -> 32 timbral + 8 temporal output channels

    params = init_frontend(k_params, y_input_dim, timbral_k_height,
                           temporal_k_width, filter_factor)
    x = jax.random.normal(k_x, (N, 1, H, W), jnp.float32)

    out = jax.block_until_ready(frontend_forward(params, x))
    ref = frontend_reference(params, x)
    assert out.shape == ref.shape, (out.shape, ref.shape)
    assert jnp.allclose(out, ref, atol=1e-3, rtol=1e-3), \
        float(jnp.max(jnp.abs(out - ref)))

    # Also exercise the negative-scale (min-select) branch of the fused pool.
    blocks_neg = [dict(b) for b in params["blocks"]]
    blocks_neg[0] = dict(blocks_neg[0], gamma=-blocks_neg[0]["gamma"])
    params_neg = dict(params, blocks=blocks_neg)
    out2 = jax.block_until_ready(frontend_forward(params_neg, x))
    ref2 = frontend_reference(params_neg, x)
    assert jnp.allclose(out2, ref2, atol=1e-3, rtol=1e-3), \
        float(jnp.max(jnp.abs(out2 - ref2)))

    print("KERNEL_OK")
</pallas_src>

<mosaic_0001>
module attributes {stable_mosaic.version = 11 : i64} {
  func.func @kernel(%arg0: i32, %arg1: i32, %arg2: memref<1x1x16x135xbf16, #tpu.memory_space<vmem>>, %arg3: memref<288x128xbf16, #tpu.memory_space<vmem>>, %arg4: memref<32x1xf32, #tpu.memory_space<vmem>>, %arg5: memref<32x1xf32, #tpu.memory_space<vmem>>, %arg6: memref<1x32x128xf32, #tpu.memory_space<vmem>>, %arg7: memref<1x1x32x1xf32, #tpu.memory_space<vmem>>, %arg8: memref<1x1x32x1xf32, #tpu.memory_space<vmem>>, %arg9: memref<288x128xf32, #tpu.memory_space<vmem>>) attributes {dimension_semantics = [#tpu.dimension_semantics<parallel>, #tpu.dimension_semantics<parallel>], iteration_bounds = array<i64: 2, 1>, scalar_prefetch = 0 : i64, scratch_operands = 1 : i64, tpu.core_type = #tpu.core_type<tc>, window_params = [{transform_indices = @transform_0, window_bounds = array<i64: 1, 1, 16, 135>}, {pipeline_mode = #tpu.pipeline_mode<synchronous>, transform_indices = @transform_1, window_bounds = array<i64: 288, 128>}, {pipeline_mode = #tpu.pipeline_mode<synchronous>, transform_indices = @transform_2, window_bounds = array<i64: 32, 1>}, {pipeline_mode = #tpu.pipeline_mode<synchronous>, transform_indices = @transform_3, window_bounds = array<i64: 32, 1>}, {transform_indices = @transform_4, window_bounds = array<i64: 1, 32, 128>}, {transform_indices = @transform_5, window_bounds = array<i64: 1, 1, 32, 1>}, {transform_indices = @transform_6, window_bounds = array<i64: 1, 1, 32, 1>}]} {
    %c0 = arith.constant 0 : index
    %c0_0 = arith.constant 0 : index
    %c0_1 = arith.constant 0 : index
    %c0_2 = arith.constant 0 : index
    %0 = vector.load %arg2[%c0, %c0_0, %c0_1, %c0_2] : memref<1x1x16x135xbf16, #tpu.memory_space<vmem>>, vector<1x1x16x135xbf16>
    %1 = vector.shape_cast %0 : vector<1x1x16x135xbf16> to vector<16x135xbf16>
    %2 = vector.extract_strided_slice %1 {offsets = [0, 0], sizes = [16, 128], strides = [1, 1]} : vector<16x135xbf16> to vector<16x128xbf16>
    %3 = vector.extract_strided_slice %1 {offsets = [0, 1], sizes = [16, 128], strides = [1, 1]} : vector<16x135xbf16> to vector<16x128xbf16>
    %4 = vector.extract_strided_slice %1 {offsets = [0, 2], sizes = [16, 128], strides = [1, 1]} : vector<16x135xbf16> to vector<16x128xbf16>
    %5 = vector.extract_strided_slice %1 {offsets = [0, 3], sizes = [16, 128], strides = [1, 1]} : vector<16x135xbf16> to vector<16x128xbf16>
    %6 = vector.extract_strided_slice %1 {offsets = [0, 4], sizes = [16, 128], strides = [1, 1]} : vector<16x135xbf16> to vector<16x128xbf16>
    %7 = vector.extract_strided_slice %1 {offsets = [0, 5], sizes = [16, 128], strides = [1, 1]} : vector<16x135xbf16> to vector<16x128xbf16>
    %8 = vector.extract_strided_slice %1 {offsets = [0, 6], sizes = [16, 128], strides = [1, 1]} : vector<16x135xbf16> to vector<16x128xbf16>
    %9 = vector.extract_strided_slice %1 {offsets = [0, 7], sizes = [16, 128], strides = [1, 1]} : vector<16x135xbf16> to vector<16x128xbf16>
    %10 = tpu.concatenate %2, %3, %4, %5, %6, %7, %8, %9 in 0 : vector<16x128xbf16>, vector<16x128xbf16>, vector<16x128xbf16>, vector<16x128xbf16>, vector<16x128xbf16>, vector<16x128xbf16>, vector<16x128xbf16>, vector<16x128xbf16> -> vector<128x128xbf16>
    %c0_3 = arith.constant 0 : index
    %c0_4 = arith.constant 0 : index
    %11 = vector.load %arg3[%c0_3, %c0_4] : memref<288x128xbf16, #tpu.memory_space<vmem>>, vector<288x128xbf16>
    %cst = arith.constant dense<0.000000e+00> : vector<288x128xf32>
    %12 = tpu.matmul %11, %10, %cst {dimension_numbers = #tpu.dot_dimension_numbers<[1], [0], [0], [1], [0, 0, 1, 1], [], []>} : vector<288x128xbf16>, vector<128x128xbf16>, vector<288x128xf32> -> vector<288x128xf32>
    %c0_5 = arith.constant 0 : index
    %c0_6 = arith.constant 0 : index
    %13 = vector.load %arg9[%c0_5, %c0_6] : memref<288x128xf32, #tpu.memory_space<vmem>>, vector<288x128xf32>
    tpu.vector_store %arg9[%c0_5, %c0_6], %12 {strides = array<i32>} : memref<288x128xf32, #tpu.memory_space<vmem>>, vector<288x128xf32>,
    %c0_7 = arith.constant 0 : index
    %c0_8 = arith.constant 0 : index
    %14 = vector.load %arg4[%c0_7, %c0_8] : memref<32x1xf32, #tpu.memory_space<vmem>>, vector<32x1xf32>
    %c0_9 = arith.constant 0 : index
    %c0_10 = arith.constant 0 : index
    %15 = vector.load %arg5[%c0_9, %c0_10] : memref<32x1xf32, #tpu.memory_space<vmem>>, vector<32x1xf32>
    %cst_11 = arith.constant 0xFF800000 : f32
    %16 = vector.broadcast %cst_11 : f32 to vector<32x128xf32>
    %cst_12 = arith.constant 0.000000e+00 : f32
    %17 = vector.broadcast %cst_12 : f32 to vector<32x128xf32>
    %cst_13 = arith.constant 0.000000e+00 : f32
    %18 = vector.broadcast %cst_13 : f32 to vector<32x128xf32>
    %c0_i32 = arith.constant 0 : i32
    %c32_i32 = arith.constant 32 : i32
    %19 = arith.muli %c0_i32, %c32_i32 : i32
    %20 = tpu.assume_multiple %19, 32 : i32
    %21 = arith.index_cast %20 : i32 to index
    %c0_14 = arith.constant 0 : index
    %22 = vector.load %arg9[%21, %c0_14] : memref<288x128xf32, #tpu.memory_space<vmem>>, vector<32x128xf32>
    %23 = vector.broadcast %14 : vector<32x1xf32> to vector<32x128xf32>
    %24 = arith.addf %22, %23 : vector<32x128xf32>
    %cst_15 = arith.constant 0.000000e+00 : f32
    %25 = vector.broadcast %cst_15 : f32 to vector<32x128xf32>
    %26 = arith.maximumf %24, %25 : vector<32x128xf32>
    %27 = vector.broadcast %15 : vector<32x1xf32> to vector<32x128xf32>
    %28 = arith.mulf %27, %26 : vector<32x128xf32>
    %29 = arith.maximumf %16, %28 : vector<32x128xf32>
    %30 = arith.addf %17, %26 : vector<32x128xf32>
    %31 = arith.mulf %26, %26 : vector<32x128xf32>
    %32 = arith.addf %18, %31 : vector<32x128xf32>
    %c1_i32 = arith.constant 1 : i32
    %c32_i32_16 = arith.constant 32 : i32
    %33 = arith.muli %c1_i32, %c32_i32_16 : i32
    %34 = tpu.assume_multiple %33, 32 : i32
    %35 = arith.index_cast %34 : i32 to index
    %c0_17 = arith.constant 0 : index
    %36 = vector.load %arg9[%35, %c0_17] : memref<288x128xf32, #tpu.memory_space<vmem>>, vector<32x128xf32>
    %37 = vector.broadcast %14 : vector<32x1xf32> to vector<32x128xf32>
    %38 = arith.addf %36, %37 : vector<32x128xf32>
    %cst_18 = arith.constant 0.000000e+00 : f32
    %39 = vector.broadcast %cst_18 : f32 to vector<32x128xf32>
    %40 = arith.maximumf %38, %39 : vector<32x128xf32>
    %41 = vector.broadcast %15 : vector<32x1xf32> to vector<32x128xf32>
    %42 = arith.mulf %41, %40 : vector<32x128xf32>
    %43 = arith.maximumf %29, %42 : vector<32x128xf32>
    %44 = arith.addf %30, %40 : vector<32x128xf32>
    %45 = arith.mulf %40, %40 : vector<32x128xf32>
    %46 = arith.addf %32, %45 : vector<32x128xf32>
    %c2_i32 = arith.constant 2 : i32
    %c32_i32_19 = arith.constant 32 : i32
    %47 = arith.muli %c2_i32, %c32_i32_19 : i32
    %48 = tpu.assume_multiple %47, 32 : i32
    %49 = arith.index_cast %48 : i32 to index
    %c0_20 = arith.constant 0 : index
    %50 = vector.load %arg9[%49, %c0_20] : memref<288x128xf32, #tpu.memory_space<vmem>>, vector<32x128xf32>
    %51 = vector.broadcast %14 : vector<32x1xf32> to vector<32x128xf32>
    %52 = arith.addf %50, %51 : vector<32x128xf32>
    %cst_21 = arith.constant 0.000000e+00 : f32
    %53 = vector.broadcast %cst_21 : f32 to vector<32x128xf32>
    %54 = arith.maximumf %52, %53 : vector<32x128xf32>
    %55 = vector.broadcast %15 : vector<32x1xf32> to vector<32x128xf32>
    %56 = arith.mulf %55, %54 : vector<32x128xf32>
    %57 = arith.maximumf %43, %56 : vector<32x128xf32>
    %58 = arith.addf %44, %54 : vector<32x128xf32>
    %59 = arith.mulf %54, %54 : vector<32x128xf32>
    %60 = arith.addf %46, %59 : vector<32x128xf32>
    %c3_i32 = arith.constant 3 : i32
    %c32_i32_22 = arith.constant 32 : i32
    %61 = arith.muli %c3_i32, %c32_i32_22 : i32
    %62 = tpu.assume_multiple %61, 32 : i32
    %63 = arith.index_cast %62 : i32 to index
    %c0_23 = arith.constant 0 : index
    %64 = vector.load %arg9[%63, %c0_23] : memref<288x128xf32, #tpu.memory_space<vmem>>, vector<32x128xf32>
    %65 = vector.broadcast %14 : vector<32x1xf32> to vector<32x128xf32>
    %66 = arith.addf %64, %65 : vector<32x128xf32>
    %cst_24 = arith.constant 0.000000e+00 : f32
    %67 = vector.broadcast %cst_24 : f32 to vector<32x128xf32>
    %68 = arith.maximumf %66, %67 : vector<32x128xf32>
    %69 = vector.broadcast %15 : vector<32x1xf32> to vector<32x128xf32>
    %70 = arith.mulf %69, %68 : vector<32x128xf32>
    %71 = arith.maximumf %57, %70 : vector<32x128xf32>
    %72 = arith.addf %58, %68 : vector<32x128xf32>
    %73 = arith.mulf %68, %68 : vector<32x128xf32>
    %74 = arith.addf %60, %73 : vector<32x128xf32>
    %c4_i32 = arith.constant 4 : i32
    %c32_i32_25 = arith.constant 32 : i32
    %75 = arith.muli %c4_i32, %c32_i32_25 : i32
    %76 = tpu.assume_multiple %75, 32 : i32
    %77 = arith.index_cast %76 : i32 to index
    %c0_26 = arith.constant 0 : index
    %78 = vector.load %arg9[%77, %c0_26] : memref<288x128xf32, #tpu.memory_space<vmem>>, vector<32x128xf32>
    %79 = vector.broadcast %14 : vector<32x1xf32> to vector<32x128xf32>
    %80 = arith.addf %78, %79 : vector<32x128xf32>
    %cst_27 = arith.constant 0.000000e+00 : f32
    %81 = vector.broadcast %cst_27 : f32 to vector<32x128xf32>
    %82 = arith.maximumf %80, %81 : vector<32x128xf32>
    %83 = vector.broadcast %15 : vector<32x1xf32> to vector<32x128xf32>
    %84 = arith.mulf %83, %82 : vector<32x128xf32>
    %85 = arith.maximumf %71, %84 : vector<32x128xf32>
    %86 = arith.addf %72, %82 : vector<32x128xf32>
    %87 = arith.mulf %82, %82 : vector<32x128xf32>
    %88 = arith.addf %74, %87 : vector<32x128xf32>
    %c5_i32 = arith.constant 5 : i32
    %c32_i32_28 = arith.constant 32 : i32
    %89 = arith.muli %c5_i32, %c32_i32_28 : i32
    %90 = tpu.assume_multiple %89, 32 : i32
    %91 = arith.index_cast %90 : i32 to index
    %c0_29 = arith.constant 0 : index
    %92 = vector.load %arg9[%91, %c0_29] : memref<288x128xf32, #tpu.memory_space<vmem>>, vector<32x128xf32>
    %93 = vector.broadcast %14 : vector<32x1xf32> to vector<32x128xf32>
    %94 = arith.addf %92, %93 : vector<32x128xf32>
    %cst_30 = arith.constant 0.000000e+00 : f32
    %95 = vector.broadcast %cst_30 : f32 to vector<32x128xf32>
    %96 = arith.maximumf %94, %95 : vector<32x128xf32>
    %97 = vector.broadcast %15 : vector<32x1xf32> to vector<32x128xf32>
    %98 = arith.mulf %97, %96 : vector<32x128xf32>
    %99 = arith.maximumf %85, %98 : vector<32x128xf32>
    %100 = arith.addf %86, %96 : vector<32x128xf32>
    %101 = arith.mulf %96, %96 : vector<32x128xf32>
    %102 = arith.addf %88, %101 : vector<32x128xf32>
    %c6_i32 = arith.constant 6 : i32
    %c32_i32_31 = arith.constant 32 : i32
    %103 = arith.muli %c6_i32, %c32_i32_31 : i32
    %104 = tpu.assume_multiple %103, 32 : i32
    %105 = arith.index_cast %104 : i32 to index
    %c0_32 = arith.constant 0 : index
    %106 = vector.load %arg9[%105, %c0_32] : memref<288x128xf32, #tpu.memory_space<vmem>>, vector<32x128xf32>
    %107 = vector.broadcast %14 : vector<32x1xf32> to vector<32x128xf32>
    %108 = arith.addf %106, %107 : vector<32x128xf32>
    %cst_33 = arith.constant 0.000000e+00 : f32
    %109 = vector.broadcast %cst_33 : f32 to vector<32x128xf32>
    %110 = arith.maximumf %108, %109 : vector<32x128xf32>
    %111 = vector.broadcast %15 : vector<32x1xf32> to vector<32x128xf32>
    %112 = arith.mulf %111, %110 : vector<32x128xf32>
    %113 = arith.maximumf %99, %112 : vector<32x128xf32>
    %114 = arith.addf %100, %110 : vector<32x128xf32>
    %115 = arith.mulf %110, %110 : vector<32x128xf32>
    %116 = arith.addf %102, %115 : vector<32x128xf32>
    %c7_i32 = arith.constant 7 : i32
    %c32_i32_34 = arith.constant 32 : i32
    %117 = arith.muli %c7_i32, %c32_i32_34 : i32
    %118 = tpu.assume_multiple %117, 32 : i32
    %119 = arith.index_cast %118 : i32 to index
    %c0_35 = arith.constant 0 : index
    %120 = vector.load %arg9[%119, %c0_35] : memref<288x128xf32, #tpu.memory_space<vmem>>, vector<32x128xf32>
    %121 = vector.broadcast %14 : vector<32x1xf32> to vector<32x128xf32>
    %122 = arith.addf %120, %121 : vector<32x128xf32>
    %cst_36 = arith.constant 0.000000e+00 : f32
    %123 = vector.broadcast %cst_36 : f32 to vector<32x128xf32>
    %124 = arith.maximumf %122, %123 : vector<32x128xf32>
    %125 = vector.broadcast %15 : vector<32x1xf32> to vector<32x128xf32>
    %126 = arith.mulf %125, %124 : vector<32x128xf32>
    %127 = arith.maximumf %113, %126 : vector<32x128xf32>
    %128 = arith.addf %114, %124 : vector<32x128xf32>
    %129 = arith.mulf %124, %124 : vector<32x128xf32>
    %130 = arith.addf %116, %129 : vector<32x128xf32>
    %c8_i32 = arith.constant 8 : i32
    %c32_i32_37 = arith.constant 32 : i32
    %131 = arith.muli %c8_i32, %c32_i32_37 : i32
    %132 = tpu.assume_multiple %131, 32 : i32
    %133 = arith.index_cast %132 : i32 to index
    %c0_38 = arith.constant 0 : index
    %134 = vector.load %arg9[%133, %c0_38] : memref<288x128xf32, #tpu.memory_space<vmem>>, vector<32x128xf32>
    %135 = vector.broadcast %14 : vector<32x1xf32> to vector<32x128xf32>
    %136 = arith.addf %134, %135 : vector<32x128xf32>
    %cst_39 = arith.constant 0.000000e+00 : f32
    %137 = vector.broadcast %cst_39 : f32 to vector<32x128xf32>
    %138 = arith.maximumf %136, %137 : vector<32x128xf32>
    %139 = vector.broadcast %15 : vector<32x1xf32> to vector<32x128xf32>
    %140 = arith.mulf %139, %138 : vector<32x128xf32>
    %141 = arith.maximumf %127, %140 : vector<32x128xf32>
    %142 = arith.addf %128, %138 : vector<32x128xf32>
    %143 = arith.mulf %138, %138 : vector<32x128xf32>
    %144 = arith.addf %130, %143 : vector<32x128xf32>
    %c9_i32 = arith.constant 9 : i32
    %145 = tpu.iota {dimensions = array<i32: 1>} : vector<1x128xi32>
    %c128_i32 = arith.constant 128 : i32
    %146 = arith.muli %arg1, %c128_i32 : i32
    %147 = vector.broadcast %146 : i32 to vector<1x128xi32>
    %148 = arith.addi %147, %145 : vector<1x128xi32>
    %c15_i32 = arith.constant 15 : i32
    %149 = vector.broadcast %c15_i32 : i32 to vector<1x128xi32>
    %150 = arith.cmpi slt, %148, %149 : vector<1x128xi32>
    %151 = arith.extui %150 : vector<1x128xi1> to vector<1x128xi32>
    %152 = arith.sitofp %151 : vector<1x128xi32> to vector<1x128xf32>
    %153 = vector.broadcast %15 : vector<32x1xf32> to vector<32x128xf32>
    %154 = arith.mulf %153, %141 : vector<32x128xf32>
    %c0_40 = arith.constant 0 : index
    %c0_41 = arith.constant 0 : index
    %c0_42 = arith.constant 0 : index
    %155 = vector.load %arg6[%c0_40, %c0_41, %c0_42] : memref<1x32x128xf32, #tpu.memory_space<vmem>>, vector<1x32x128xf32>
    %156 = vector.shape_cast %155 : vector<1x32x128xf32> to vector<32x128xf32>
    %157 = vector.shape_cast %154 : vector<32x128xf32> to vector<1x32x128xf32>
    tpu.vector_store %arg6[%c0_40, %c0_41, %c0_42], %157 {strides = array<i32>} : memref<1x32x128xf32, #tpu.memory_space<vmem>>, vector<1x32x128xf32>,
    %158 = vector.broadcast %152 : vector<1x128xf32> to vector<32x128xf32>
    %159 = arith.mulf %142, %158 : vector<32x128xf32>
    %cst_43 = arith.constant dense<0.000000e+00> : vector<32xf32>
    %160 = vector.multi_reduction <add>, %159, %cst_43 [1] : vector<32x128xf32> to vector<32xf32>
    %161 = vector.shape_cast %160 : vector<32xf32> to vector<32x1xf32>
    %c0_44 = arith.constant 0 : index
    %c0_45 = arith.constant 0 : index
    %c0_46 = arith.constant 0 : index
    %c0_47 = arith.constant 0 : index
    %162 = vector.load %arg7[%c0_44, %c0_45, %c0_46, %c0_47] : memref<1x1x32x1xf32, #tpu.memory_space<vmem>>, vector<1x1x32x1xf32>
    %163 = vector.shape_cast %162 : vector<1x1x32x1xf32> to vector<32x1xf32>
    %164 = vector.shape_cast %161 : vector<32x1xf32> to vector<1x1x32x1xf32>
    tpu.vector_store %arg7[%c0_44, %c0_45, %c0_46, %c0_47], %164 {strides = array<i32>} : memref<1x1x32x1xf32, #tpu.memory_space<vmem>>, vector<1x1x32x1xf32>,
    %165 = vector.broadcast %152 : vector<1x128xf32> to vector<32x128xf32>
    %166 = arith.mulf %144, %165 : vector<32x128xf32>
    %cst_48 = arith.constant dense<0.000000e+00> : vector<32xf32>
    %167 = vector.multi_reduction <add>, %166, %cst_48 [1] : vector<32x128xf32> to vector<32xf32>
    %168 = vector.shape_cast %167 : vector<32xf32> to vector<32x1xf32>
    %c0_49 = arith.constant 0 : index
    %c0_50 = arith.constant 0 : index
    %c0_51 = arith.constant 0 : index
    %c0_52 = arith.constant 0 : index
    %169 = vector.load %arg8[%c0_49, %c0_50, %c0_51, %c0_52] : memref<1x1x32x1xf32, #tpu.memory_space<vmem>>, vector<1x1x32x1xf32>
    %170 = vector.shape_cast %169 : vector<1x1x32x1xf32> to vector<32x1xf32>
    %171 = vector.shape_cast %168 : vector<32x1xf32> to vector<1x1x32x1xf32>
    tpu.vector_store %arg8[%c0_49, %c0_50, %c0_51, %c0_52], %171 {strides = array<i32>} : memref<1x1x32x1xf32, #tpu.memory_space<vmem>>, vector<1x1x32x1xf32>,
    return
  }
  func.func @transform_0(%arg0: i32, %arg1: i32) -> (i32, i32, i32, i32) {
    %c0_i32 = arith.constant 0 : i32
    %c0_i32_0 = arith.constant 0 : i32
    %c0_i32_1 = arith.constant 0 : i32
    return %arg0, %arg1, %c0_i32, %c0_i32_0 : i32, i32, i32, i32
  }
  func.func @transform_1(%arg0: i32, %arg1: i32) -> (i32, i32) {
    %c0_i32 = arith.constant 0 : i32
    %c0_i32_0 = arith.constant 0 : i32
    %c0_i32_1 = arith.constant 0 : i32
    return %c0_i32, %c0_i32_0 : i32, i32
  }
  func.func @transform_2(%arg0: i32, %arg1: i32) -> (i32, i32) {
    %c0_i32 = arith.constant 0 : i32
    %c0_i32_0 = arith.constant 0 : i32
    %c0_i32_1 = arith.constant 0 : i32
    return %c0_i32, %c0_i32_0 : i32, i32
  }
  func.func @transform_3(%arg0: i32, %arg1: i32) -> (i32, i32) {
    %c0_i32 = arith.constant 0 : i32
    %c0_i32_0 = arith.constant 0 : i32
    %c0_i32_1 = arith.constant 0 : i32
    return %c0_i32, %c0_i32_0 : i32, i32
  }
  func.func @transform_4(%arg0: i32, %arg1: i32) -> (i32, i32, i32) {
    %c0_i32 = arith.constant 0 : i32
    %c0_i32_0 = arith.constant 0 : i32
    return %arg0, %c0_i32, %arg1 : i32, i32, i32
  }
  func.func @transform_5(%arg0: i32, %arg1: i32) -> (i32, i32, i32, i32) {
    %c0_i32 = arith.constant 0 : i32
    %c0_i32_0 = arith.constant 0 : i32
    %c0_i32_1 = arith.constant 0 : i32
    return %arg0, %arg1, %c0_i32, %c0_i32_0 : i32, i32, i32, i32
  }
  func.func @transform_6(%arg0: i32, %arg1: i32) -> (i32, i32, i32, i32) {
    %c0_i32 = arith.constant 0 : i32
    %c0_i32_0 = arith.constant 0 : i32
    %c0_i32_1 = arith.constant 0 : i32
    return %arg0, %arg1, %c0_i32, %c0_i32_0 : i32, i32, i32, i32
  }
}

</mosaic_0001>

<bundles_post_ra>
// kernel: tpu_custom_call.1
= control target key start
LH: loop header
LB: loop body
LE: loop exit
PB: predicated region body
PF: predicated region fallthrough
CT: control target
= control target key end

     0   :  { %12 = vsyncpa [#allocation4], 0  ;;  %s2282_s0 = inlined_call_operand.vmem [shape: bf16[2,1,16,135], index: 0, kind: input, shape index: {}]   ;;  %s2283_s1 = inlined_call_operand.hbm [shape: bf16[288,128], index: 1, kind: input, shape index: {}]   ;;  %s2284_s2 = inlined_call_operand.vmem [shape: f32[32,1], index: 2, kind: input, shape index: {}]   ;;  %s2285_s3 = inlined_call_operand.vmem [shape: f32[32,1], index: 3, kind: input, shape index: {}]   ;;  %s2286_s4 = inlined_call_operand.hbm [shape: f32[2,32,128], index: 4, kind: output, shape index: {0}]   ;;  %s2287_s5 = inlined_call_operand.vmem [shape: f32[2,1,32,1], index: 5, kind: output, shape index: {1}]   ;;  %s2288_s6 = inlined_call_operand.vmem [shape: f32[2,1,32,1], index: 6, kind: output, shape index: {2}]  }
   0x1   :  { %13 = vsyncpa [#allocation5], 0 }
   0x2   :  { %15 = vsyncpa [#allocation5 + $0x1], 0  ;;  %s1757_s21 = smov 0   ;;  %s1759_s22 = smov 0  }
   0x3   :  { %s1761_s23 = smov 0   ;;  %s1763_s24 = smov 0  }
   0x4   :  { %s1765_s25 = smov 0   ;;  %s1767_s26 = smov 0  }
   0x5 LB: > { %s1359_s27 = sadd.s32 4294967295, %s1705_s26   ;;  %s1360_s28 = sadd.s32 4294967294, %s1705_s26   ;;  %s1705_s26 = sphi %s1767_s26, %s21_s26   ;;  %s1701_s25 = sphi %s1765_s25, %s2340_s25   ;;  %s1697_s24 = sphi %s1763_s24, %s2339_s24   ;;  %s1693_s23 = sphi %s1761_s23, %s2338_s23   ;;  %s1689_s22 = sphi %s1759_s22, %s2337_s22   ;;  %s1685_s21 = sphi %s1757_s21, %s2336_s21  }
   0x6   : > { %s33_s29 = sadd.s32 1, %s1701_s25  ;;  %s133_s30 = sadd.s32 1, %s1693_s23 }
   0x7   : > { %p35_p0 = scmp.ge.s32.totalorder %s33_s29, 2  ;;  %p143_p1 = scmp.ne.s32.totalorder %s1693_s23, %s1689_s22 }
   0x8   : > { %p144_p2 = scmp.eq.s32.totalorder %s1359_s27, 1  ;;  %p149_p3 = scmp.ne.s32.totalorder %s1689_s22, %s1685_s21 }
   0x9   : > { %s2342_s29 = smov (%p35_p0, %s33_s29), 0  ;;  %p150_p5 = scmp.eq.s32.totalorder %s1360_s28, 1 }
   0xa   : > { %p1797_p4 = por %p144_p2, %p143_p1  ;;  %s128_s8 = ssub.s32 %s1701_s25, %s2342_s29 }
   0xb   : > { %p1361_p6 = scmp.ge.s32.totalorder %s1705_s26, 1  ;;  %p131_p7 = scmp.eq.s32.totalorder %s128_s8, 0 }
   0xc   : > { %p1804_p8 = por %p150_p5, %p149_p3  ;;  %p213_p9 = scmp.lt.s32.totalorder %s1705_s26, 3 }
   0xd   : > { %s1810_s10 = scalar_select %p131_p7, %s1693_s23, %s133_s30  }
   0xe   : > { %p1812_p10 = pnand %p1361_p6, %p213_p9  ;;  %p1816_p11 = scmp.eq.s32.totalorder %s1359_s27, 0 }
   0xf   : > { %s1707_s13 = smov [#allocation3]  }
  0x10   : > { %p1503_p12 = pneg %p1812_p10  ;;  %s225_s14 = sshll.u32 %s1707_s13, 4  ;;  %s226_s14 = int_to_ptr.vmem [resolvable:$true] %s225_s14 }
  0x11   : > { %s1610_s15 = scalar_lea.vmem %s226_s14, 2304  ;;  %p1618_p5 = scmp.lt.s32.totalorder %s226_s14, %s226_s14 }
  0x12   : > { %p1504_p13 = pnand %p1816_p11, %p1503_p12  ;;  %p1611_p1 = scmp.ne.s32.totalorder %s226_s14, %s1610_s15 }
  0x13   : > { %p1619_p6 = scmp.lt.s32.totalorder %s1610_s15, %s1610_s15 }
  0x14   : > { %p1601_p0 = pneg %p1504_p13 }
  0x15   : > { %p1620_p7 = por %p1619_p6, %p1618_p5 }
  0x16   : > { %p1613_p2 = pnand %p1611_p1, %p1601_p0 }
  0x18   : > { %p1614_p3 = pneg %p1613_p2 }
  0x1a   : > { %p1621_p9 = pnand %p1620_p7, %p1614_p3 }
  0x1c   : > { %1624 = shalt.err (!%p1621_p9)
}
  0x1d   : > { %s1708_s16 = smov 64   ;;  %s1709_s17 = smov 4  }
  0x1e   : > { %1506 = dma.hbm_to_vmem [thread:$0]  (!%p1504_p13), %s2283_s1, 2304, %s226_s14, [#allocation4], %s1708_s16, %s1708_s16, %s1709_s17  }
  0x1f   : > { %259 = sbr.rel (%p1812_p10) target bundleno = 601 (0x259), region = 36 }
  0x24   : > { %1676 = dma.done.wait (%p1816_p11), [#allocation4], 2304  }
  0x25   : > { %1678 = vsyncadd (%p1816_p11), [#allocation4], 4294964992  ;;  %p311_p12 = scmp.lt.s32.totalorder %s1697_s24, 1  ;;  %s1710_s11 = smov 122   ;;  %v1581_v2 = vld [vmem:[#allocation3] sm:$0xff]   ;;  %v1582_v3 = vld [vmem:[#allocation3 + $0x50] sm:$0xff]   ;;  %v1096_v53 = vlaneseq }
  0x26   : > { %s1711_s13 = smov 121   ;;  %s1712_s12 = smov 123   ;;  %1445 = vmatprep.mubr.bf16.mxu0 %v1581_v2  ;;  %1465 = vmatprep.mubr.bf16.mxu1 %v1582_v3  ;;  %v757_v4 = vld [vmem:[%s2284_s2 + $0x8] sm:$0xff]  ;;  %v756_v5 = vld [vmem:[%s2284_s2] sm:$0xff]  ;;  %v1717_v6 = vmov 0   ;;  %v758_v7 = vld [vmem:[%s2284_s2 + $0x10] sm:$0xff] }
  0x27   : > { %s1835_s20 = scalar_select %p311_p12, %s1697_s24, 1  ;;  %1577 = vset.pattern.permute.xlu1 %v1717_v6  ;;  %1576 = vset.pattern.permute.xlu0 %v1717_v6  ;;  %v759_v8 = vld [vmem:[%s2284_s2 + $0x18] sm:$0xff]  ;;  %v760_v9 = vld [vmem:[%s2285_s3] sm:$0xff]  ;;  %v761_v10 = vld [vmem:[%s2285_s3 + $0x8] sm:$0xff]  ;;  %vm396_vm0 = vcmask 990208   ;;  %vm389_vm1 = vcmask 998400  }
  0x28   : > { %s1713_s14 = smov 124   ;;  %s1714_s15 = smov 125   ;;  %v762_v11 = vld [vmem:[%s2285_s3 + $0x10] sm:$0xff]  ;;  %v763_v12 = vld [vmem:[%s2285_s3 + $0x18] sm:$0xff]  ;;  %vm382_vm2 = vcmask 1006592   ;;  %vm375_vm3 = vcmask 1014784  }
  0x29   : > { %s1399_s27 = sshll.u32 %s1835_s20, 4  ;;  %s1715_s16 = smov 126   ;;  %vm368_vm4 = vcmask 1022976   ;;  %vm361_vm5 = vcmask 1031168   ;;  %vm354_vm6 = vcmask 1039360   ;;  %v1583_v34 = vld [vmem:[#allocation3 + $0x8] sm:$0xff]  }
  0x2a   : > { %s319_s8 = scalar_lea.vmem %s2282_s0, %s1399_s27  ;;  %s1716_s17 = smov 127   ;;  %v1584_v35 = vld [vmem:[#allocation3 + $0x58] sm:$0xff]   ;;  %v1585_v36 = vld [vmem:[#allocation3 + $0x10] sm:$0xff]   ;;  %v1586_v37 = vld [vmem:[#allocation3 + $0x60] sm:$0xff]   ;;  %v1097_v57 = vand.u32 127, %v1096_v53 }
  0x2b   : > { %v1841_v0 = vld [vmem:[%s319_s8] ss:$8 sps:$4 sm:$0xff]   ;;  %v1580_v1 = vld [vmem:[%s319_s8 + $0x4] ss:$8 sps:$4 sm:$0xff]   ;;  %v1587_v38 = vld [vmem:[#allocation3 + $0x18] sm:$0xff]   ;;  %s286_s28 = sand.u32 1, %s1689_s22  }
  0x2c   : > { %385 = vrot.lane.b32.xlu1 %v1841_v0, %s1710_s11  ;;  %392 = vrot.lane.b32.xlu0 %v1841_v0, %s1711_s13  ;;  %v1588_v39 = vld [vmem:[#allocation3 + $0x68] sm:$0xff]   ;;  %v1589_v40 = vld [vmem:[#allocation3 + $0x20] sm:$0xff]   ;;  %v1590_v41 = vld [vmem:[#allocation3 + $0x70] sm:$0xff]   ;;  %vm1101_vm7 = vcmp.lt.s32.totalorder %v1097_v57, 15  ;;  %s1366_s30 = sshll.u32 %s286_s28, 5 }
  0x2d   : > { %v1591_v42 = vld [vmem:[#allocation3 + $0x28] sm:$0xff]   ;;  %v1592_v43 = vld [vmem:[#allocation3 + $0x78] sm:$0xff]   ;;  %v1593_v44 = vld [vmem:[#allocation3 + $0x30] sm:$0xff]   ;;  %s2165_s8 = scalar_lea.vmem [#allocation6], %s1366_s30 }
  0x2e   : > { %v1594_v45 = vld [vmem:[#allocation3 + $0x80] sm:$0xff]   ;;  %v1595_v46 = vld [vmem:[#allocation3 + $0x38] sm:$0xff]   ;;  %v1596_v47 = vld [vmem:[#allocation3 + $0x88] sm:$0xff]  }
  0x2f   : > { %v1597_v48 = vld [vmem:[#allocation3 + $0x40] sm:$0xff]   ;;  %v1598_v49 = vld [vmem:[#allocation3 + $0x48] sm:$0xff]  }
  0x30   : > { %387 = vrot.lane.b32.xlu1 %v1580_v1, %s1710_s11  ;;  %394 = vrot.lane.b32.xlu0 %v1580_v1, %s1711_s13  ;;  %s1402_s11 = sshll.u32 %s1697_s24, 9  ;;  %s1719_s24 = smov [#allocation6]  }
  0x31   : > { %s1629_s18 = sshll.u32 %s1719_s24, 4  ;;  %s1630_s18 = int_to_ptr.vmem [resolvable:$false] %s1629_s18 }
  0x32   : > { %s1631_s19 = scalar_lea.vmem %s1630_s18, 1024 }
  0x34   : > { %380 = vrot.lane.b32.xlu1 %v1580_v1, %s1712_s12  ;;  %378 = vrot.lane.b32.xlu0 %v1841_v0, %s1712_s12 }
  0x38   : > { %373 = vrot.lane.b32.xlu1 %v1580_v1, %s1713_s14  ;;  %371 = vrot.lane.b32.xlu0 %v1841_v0, %s1713_s14  ;;  %s2215_s14 = scalar_lea.hbm %s2286_s4, %s1402_s11 }
  0x3c   : > { %366 = vrot.lane.b32.xlu1 %v1580_v1, %s1714_s15  ;;  %364 = vrot.lane.b32.xlu0 %v1841_v0, %s1714_s15  ;;  %s1178_s15 = sshll.u32 %s2165_s8, 4  ;;  %s2218_s15 = int_to_ptr.vmem [resolvable:$true] %s1178_s15 }
  0x3d   : > { %p1632_p0 = scmp.lt.s32.totalorder %s2218_s15, %s1630_s18 }
  0x40   : > { %359 = vrot.lane.b32.xlu1 %v1580_v1, %s1715_s16  ;;  %357 = vrot.lane.b32.xlu0 %v1841_v0, %s1715_s16  ;;  %s2222_s16 = scalar_lea.sflag [#allocation5], %s286_s28 }
  0x44   : > { %352 = vrot.lane.b32.xlu1 %v1580_v1, %s1716_s17  ;;  %350 = vrot.lane.b32.xlu0 %v1841_v0, %s1716_s17  ;;  %s1625_s17 = scalar_lea.vmem %s2218_s15, 512 }
  0x45   : > { %p1626_p10 = scmp.ne.s32.totalorder %s2218_s15, %s1625_s17  ;;  %p1633_p1 = scmp.lt.s32.totalorder %s1631_s19, %s1625_s17 }
  0x47   : > { %p1627_p11 = pnand %p1626_p10, %p1797_p4  ;;  %p1634_p2 = por %p1633_p1, %p1632_p0 }
  0x48   : > { %775 = vperm.xlu1 %1577, %v757_v4   ;;  %770 = vperm.xlu0 %1576, %v756_v5  }
  0x49   : > { %p1628_p13 = pneg %p1627_p11 }
  0x4b   : > { %p1635_p3 = pnand %p1634_p2, %p1628_p13 }
  0x4c   : > { %780 = vperm.xlu1 %1577, %v758_v7   ;;  %785 = vperm.xlu0 %1576, %v759_v8  }
  0x50   : > { %798 = vperm.xlu1 %1577, %v760_v9   ;;  %803 = vperm.xlu0 %1576, %v761_v10  }
  0x54   : > { %808 = vperm.xlu1 %1577, %v762_v11   ;;  %813 = vperm.xlu0 %1576, %v763_v12  }
  0x9e   : > { %v386_v13 = vpop.permute.xlu1 %385  ;;  %v393_v14 = vpop.permute.xlu0 %392 }
  0xa2   : > { %v388_v15 = vpop.permute.xlu1 %387  ;;  %v395_v16 = vpop.permute.xlu0 %394 }
  0xa3   : > { %v397_v17 = vsel %vm396_vm0, %v393_v14, %v395_v16  ;;  %v390_v18 = vsel %vm389_vm1, %v386_v13, %v388_v15  ;;  %v1718_v15 = vmov 0.0  }
  0xa4   : > { %1429 = vmatprep.subr.bf16.mxu0 %v397_v17  ;;  %1481 = vmatprep.subr.bf16.mxu1 %v397_v17  ;;  %v1906_v16 = vsel %vm1101_vm7, 1.0, %v1718_v15 }
  0xa5   : > { %1430 = vmatpush3.bf16.msra.mxu0 %v397_v17  ;;  %1489 = vmatpush3.bf16.msra.mxu1 %v397_v17 }
  0xa6   : > { %1431 = vmatprep.subr.bf16.mxu0 %v390_v18  ;;  %1482 = vmatprep.subr.bf16.mxu1 %v390_v18  ;;  %v381_v19 = vpop.permute.xlu1 %380  ;;  %v379_v20 = vpop.permute.xlu0 %378 }
  0xa7   : > { %v383_v21 = vsel %vm382_vm2, %v379_v20, %v381_v19 }
  0xa9   : > { %1432 = vmatpush3.bf16.msra.mxu0 %v390_v18  ;;  %1490 = vmatpush3.bf16.msra.mxu1 %v390_v18 }
  0xaa   : > { %1433 = vmatprep.subr.bf16.mxu0 %v383_v21  ;;  %1483 = vmatprep.subr.bf16.mxu1 %v383_v21  ;;  %v374_v22 = vpop.permute.xlu1 %373  ;;  %v372_v23 = vpop.permute.xlu0 %371 }
  0xab   : > { %v376_v24 = vsel %vm375_vm3, %v372_v23, %v374_v22 }
  0xad   : > { %1434 = vmatpush3.bf16.msra.mxu0 %v383_v21  ;;  %1491 = vmatpush3.bf16.msra.mxu1 %v383_v21 }
  0xae   : > { %1435 = vmatprep.subr.bf16.mxu0 %v376_v24  ;;  %1484 = vmatprep.subr.bf16.mxu1 %v376_v24  ;;  %v367_v25 = vpop.permute.xlu1 %366  ;;  %v365_v26 = vpop.permute.xlu0 %364 }
  0xaf   : > { %v369_v27 = vsel %vm368_vm4, %v365_v26, %v367_v25 }
  0xb1   : > { %1436 = vmatpush3.bf16.msra.mxu0 %v376_v24  ;;  %1492 = vmatpush3.bf16.msra.mxu1 %v376_v24 }
  0xb2   : > { %1437 = vmatprep.subr.bf16.mxu0 %v369_v27  ;;  %1485 = vmatprep.subr.bf16.mxu1 %v369_v27  ;;  %v360_v28 = vpop.permute.xlu1 %359  ;;  %v358_v29 = vpop.permute.xlu0 %357 }
  0xb3   : > { %v362_v30 = vsel %vm361_vm5, %v358_v29, %v360_v28 }
  0xb5   : > { %1438 = vmatpush3.bf16.msra.mxu0 %v369_v27  ;;  %1493 = vmatpush3.bf16.msra.mxu1 %v369_v27 }
  0xb6   : > { %1439 = vmatprep.subr.bf16.mxu0 %v362_v30  ;;  %1486 = vmatprep.subr.bf16.mxu1 %v362_v30  ;;  %v353_v31 = vpop.permute.xlu1 %352  ;;  %v351_v32 = vpop.permute.xlu0 %350 }
  0xb7   : > { %v355_v33 = vsel %vm354_vm6, %v351_v32, %v353_v31 }
  0xb9   : > { %1440 = vmatpush3.bf16.msra.mxu0 %v362_v30  ;;  %1494 = vmatpush3.bf16.msra.mxu1 %v362_v30 }
  0xba   : > { %1441 = vmatprep.subr.bf16.mxu0 %v355_v33  ;;  %1487 = vmatprep.subr.bf16.mxu1 %v355_v33 }
  0xbd   : > { %1442 = vmatpush3.bf16.msra.mxu0 %v355_v33  ;;  %1495 = vmatpush3.bf16.msra.mxu1 %v355_v33 }
  0xbe   : > { %1443 = vmatprep.subr.bf16.mxu0 %v1841_v0  ;;  %1488 = vmatprep.subr.bf16.mxu1 %v1841_v0 }
  0xc1   : > { %1444 = vmatpush3.bf16.msra.mxu0 %v1841_v0  ;;  %1496 = vmatpush3.bf16.msra.mxu1 %v1841_v0 }
  0xc3   : > { %v1878_v50 = vpop.permute.xlu1 %775  ;;  %v1882_v52 = vpop.permute.xlu0 %770 }
  0xc4   : > { %1446 = vmatmul.mubr.bf16.vlgmr.msra.gmra.mxu0 %v1583_v34  ;;  %1466 = vmatmul.mubr.bf16.vlgmr.msra.gmra.mxu1 %v1584_v35 }
  0xc5   : > { %1449 = vmatprep.mubr.bf16.mxu0 %v1585_v36  ;;  %1469 = vmatprep.mubr.bf16.mxu1 %v1586_v37 }
  0xc7   : > { %v1880_v51 = vpop.permute.xlu1 %780  ;;  %v1888_v60 = vpop.permute.xlu0 %785 }
  0xcb   : > { %v1884_v54 = vpop.permute.xlu1 %798  ;;  %v1904_v14 = vpop.permute.xlu0 %803 }
  0xcc   : > { %1450 = vmatmul.mubr.bf16.gmra.mxu0 %v1587_v38  ;;  %1470 = vmatmul.mubr.bf16.gmra.mxu1 %v1588_v39 }
  0xcd   : > { %1453 = vmatprep.mubr.bf16.mxu0 %v1589_v40  ;;  %1473 = vmatprep.mubr.bf16.mxu1 %v1590_v41 }
  0xcf   : > { %v1894_v5 = vpop.permute.xlu1 %808 }
  0xd4   : > { %1454 = vmatmul.mubr.bf16.gmra.mxu0 %v1591_v42  ;;  %1474 = vmatmul.mubr.bf16.gmra.mxu1 %v1592_v43 }
  0xd5   : > { %1457 = vmatprep.mubr.bf16.mxu0 %v1593_v44  ;;  %1477 = vmatprep.mubr.bf16.mxu1 %v1594_v45 }
  0xdc   : > { %1458 = vmatmul.mubr.bf16.gmra.mxu0 %v1595_v46  ;;  %1478 = vmatmul.mubr.bf16.gmra.mxu1 %v1596_v47  ;;  %v1959_v47 = vpop.permute.xlu0 %813 }
  0xdd   : > { %1461 = vmatprep.mubr.bf16.mxu0 %v1597_v48 }
  0xe4   : > { %1462 = vmatmul.mubr.bf16.gmra.mxu0 %v1598_v49 }
 0x184   : > { %v1447_v55 = vpop.f32.mrf.mxu0  ;;  %v1467_v56 = vpop.f32.mrf.mxu1 }
 0x185   : > { %v790_v58 = vadd.f32 %v1447_v55, %v1880_v51  ;;  %v971_v59 = vadd.f32 %v1467_v56, %v1880_v51 }
 0x186   : > { %v577_v61 = vpop.f32.mrf.mxu0  ;;  %v657_v62 = vpop.f32.mrf.mxu1 }
 0x187   : > { %v794_v63 = vmax.f32 %v790_v58, 0.0  ;;  %v1890_v0 = vmax.f32 %v971_v59, 0.0  ;;  %v788_v1 = vadd.f32 %v1882_v52, %v577_v61  ;;  %v969_v2 = vadd.f32 %v1882_v52, %v657_v62 }
 0x188   : > { %v1448_v3 = vpop.f32.mrf.mxu0  ;;  %v1468_v4 = vpop.f32.mrf.mxu1 }
 0x189   : > { %v792_v6 = vmax.f32 %v788_v1, 0.0  ;;  %v791_v7 = vadd.f32 %v1448_v3, %v1888_v60  ;;  %v972_v8 = vadd.f32 %v1468_v4, %v1888_v60  ;;  %v826_v11 = vmul.f32 %v794_v63, %v794_v63 }
 0x18a   : > { %v580_v9 = vpop.f32.mrf.mxu0  ;;  %v660_v10 = vpop.f32.mrf.mxu1  ;;  %v1900_v12 = vmul.f32 %v1890_v0, %v1890_v0  ;;  %v1902_v13 = vmax.f32 %v969_v2, 0.0  ;;  %v1915_v23 = vmul.f32 %v1894_v5, %v794_v63  ;;  %v1921_v26 = vmul.f32 %v1890_v0, %v1894_v5 }
 0x18b   : > { %v1908_v17 = vmax.f32 %v791_v7, 0.0  ;;  %v1910_v18 = vmax.f32 %v972_v8, 0.0  ;;  %v789_v19 = vadd.f32 %v1878_v50, %v580_v9  ;;  %v970_v20 = vadd.f32 %v1878_v50, %v660_v10 }
 0x18c   : > { %2300 = vst [vmem:[#allocation9_spill] sm:$0xff] %v1900_v12  ;;  %v1451_v21 = vpop.f32.mrf.mxu0  ;;  %v1471_v22 = vpop.f32.mrf.mxu1  ;;  %v1924_v27 = vmul.f32 %v1884_v54, %v792_v6  ;;  %v824_v28 = vmul.f32 %v792_v6, %v792_v6  ;;  %v1936_v37 = vmul.f32 %v1902_v13, %v1884_v54  ;;  %v1940_v38 = vmul.f32 %v1902_v13, %v1902_v13 }
 0x18d   : > { %v839_v24 = vadd.f32 %v1451_v21, %v1880_v51  ;;  %v1004_v25 = vadd.f32 %v1471_v22, %v1880_v51  ;;  %v1926_v29 = vmax.f32 %v789_v19, 0.0  ;;  %v1928_v30 = vmax.f32 %v970_v20, 0.0 }
 0x18e   : > { %v593_v31 = vpop.f32.mrf.mxu0  ;;  %v673_v32 = vpop.f32.mrf.mxu1  ;;  %2301 = vst [vmem:[#allocation10_spill] sm:$0xff] %v1940_v38  ;;  %v827_v39 = vmul.f32 %v1908_v17, %v1908_v17  ;;  %v1946_v40 = vmul.f32 %v1910_v18, %v1910_v18  ;;  %v1988_v3 = vmul.f32 %v1959_v47, %v1908_v17 }
 0x18f   : > { %v843_v33 = vmax.f32 %v839_v24, 0.0  ;;  %v1930_v34 = vmax.f32 %v1004_v25, 0.0  ;;  %v837_v35 = vadd.f32 %v1882_v52, %v593_v31  ;;  %v1002_v36 = vadd.f32 %v1882_v52, %v673_v32 }
 0x190   : > { %2302 = vst [vmem:[#allocation11_spill] sm:$0xff] %v1946_v40  ;;  %v1452_v41 = vpop.f32.mrf.mxu0  ;;  %v1472_v42 = vpop.f32.mrf.mxu1  ;;  %v1950_v43 = vmul.f32 %v1904_v14, %v1926_v29  ;;  %v1954_v44 = vmul.f32 %v1926_v29, %v1926_v29  ;;  %v1963_v48 = vmul.f32 %v1928_v30, %v1904_v14  ;;  %v1967_v49 = vmul.f32 %v1928_v30, %v1928_v30 }
 0x191   : > { %v1957_v45 = vmul.f32 %v843_v33, %v1894_v5  ;;  %v859_v46 = vmul.f32 %v843_v33, %v843_v33  ;;  %v855_v53 = vadd.f32 %v843_v33, %v794_v63  ;;  %v841_v55 = vmax.f32 %v837_v35, 0.0 }
 0x192   : > { %2303 = vst [vmem:[#allocation12_spill] sm:$0xff] %v1967_v49  ;;  %v596_v56 = vpop.f32.mrf.mxu0  ;;  %v676_v57 = vpop.f32.mrf.mxu1  ;;  %v1971_v58 = vmul.f32 %v1930_v34, %v1894_v5  ;;  %v1973_v59 = vmax.f32 %v1002_v36, 0.0  ;;  %v840_v61 = vadd.f32 %v1452_v41, %v1888_v60  ;;  %v1005_v62 = vadd.f32 %v1472_v42, %v1888_v60 }
 0x193   : > { %v851_v1 = vmax.f32 %v1915_v23, %v1957_v45  ;;  %v1981_v2 = vmul.f32 %v1930_v34, %v1930_v34  ;;  %v1984_v63 = vmul.f32 %v841_v55, %v1884_v54  ;;  %v863_v8 = vadd.f32 %v859_v46, %v826_v11 }
 0x194   : > { %v1455_v4 = vpop.f32.mrf.mxu0  ;;  %v1475_v7 = vpop.f32.mrf.mxu1  ;;  %v857_v9 = vmul.f32 %v841_v55, %v841_v55  ;;  %v844_v10 = vmax.f32 %v840_v61, 0.0  ;;  %v838_v15 = vadd.f32 %v1878_v50, %v596_v56  ;;  %v853_v19 = vadd.f32 %v841_v55, %v792_v6 }
 0x195   : > { %2304 = vst [vmem:[#allocation13_spill] sm:$0xff] %v1981_v2  ;;  %v1991_v20 = vmax.f32 %v1005_v62, 0.0  ;;  %v1003_v21 = vadd.f32 %v1878_v50, %v676_v57  ;;  %v872_v22 = vadd.f32 %v1455_v4, %v1880_v51  ;;  %v1997_v25 = vmul.f32 %v1973_v59, %v1884_v54 }
 0x196   : > { %v609_v23 = vpop.f32.mrf.mxu0  ;;  %v689_v24 = vpop.f32.mrf.mxu1  ;;  %v2001_v11 = vmul.f32 %v1973_v59, %v1973_v59  ;;  %v2004_v31 = vmul.f32 %v844_v10, %v1959_v47  ;;  %v860_v6 = vmul.f32 %v844_v10, %v844_v10  ;;  %v849_v32 = vmax.f32 %v1924_v27, %v1984_v63 }
 0x197   : > { %2305 = vst [vmem:[#allocation14_spill] sm:$0xff] %v1991_v20  ;;  %v842_v33 = vmax.f32 %v838_v15, 0.0  ;;  %v2008_v35 = vmax.f32 %v1003_v21, 0.0  ;;  %v876_v36 = vmax.f32 %v872_v22, 0.0  ;;  %v861_v45 = vadd.f32 %v857_v9, %v824_v28 }
 0x198   : > { %2306 = vst [vmem:[#allocation15_spill] sm:$0xff] %v2001_v11  ;;  %v1456_v41 = vpop.f32.mrf.mxu0  ;;  %v1476_v42 = vpop.f32.mrf.mxu1  ;;  %v856_v46 = vadd.f32 %v844_v10, %v1908_v17  ;;  %v1037_v55 = vadd.f32 %v1475_v7, %v1880_v51  ;;  %v870_v56 = vadd.f32 %v1882_v52, %v609_v23  ;;  %v2015_v57 = vmul.f32 %v1991_v20, %v1959_v47 }
 0x199   : > { %2307 = vst [vmem:[#allocation16_spill] sm:$0xff] %v2008_v35  ;;  %v2019_v27 = vmul.f32 %v1991_v20, %v1991_v20  ;;  %v846_v61 = vmul.f32 %v842_v33, %v1904_v14  ;;  %v858_v62 = vmul.f32 %v842_v33, %v842_v33  ;;  %v852_v17 = vmax.f32 %v1988_v3, %v2004_v31 }
 0x19a   : > { %v612_v63 = vpop.f32.mrf.mxu0  ;;  %v692_v4 = vpop.f32.mrf.mxu1  ;;  %v864_v28 = vadd.f32 %v860_v6, %v827_v39  ;;  %v854_v7 = vadd.f32 %v842_v33, %v1926_v29  ;;  %v880_v9 = vmul.f32 %v876_v36, %v1894_v5  ;;  %v2028_v10 = vmul.f32 %v2008_v35, %v1904_v14 }
 0x19b   : > { %2308 = vst [vmem:[#allocation17_spill] sm:$0xff] %v2019_v27  ;;  %v2032_v15 = vmul.f32 %v2008_v35, %v2008_v35  ;;  %v892_v21 = vmul.f32 %v876_v36, %v876_v36  ;;  %v874_v22 = vmax.f32 %v870_v56, 0.0  ;;  %v888_v40 = vadd.f32 %v876_v36, %v855_v53 }
 0x19c   : > { %2309 = vst [vmem:[#allocation18_spill] sm:$0xff] %v2028_v10  ;;  %v1459_v23 = vpop.f32.mrf.mxu0  ;;  %v1479_v27 = vpop.f32.mrf.mxu1  ;;  %v2034_v2 = vmax.f32 %v1037_v55, 0.0  ;;  %v1035_v39 = vadd.f32 %v1882_v52, %v689_v24  ;;  %v873_v29 = vadd.f32 %v1456_v41, %v1888_v60  ;;  %v850_v3 = vmax.f32 %v1950_v43, %v846_v61 }
 0x19d   : > { %2310 = vst [vmem:[#allocation19_spill] sm:$0xff] %v2032_v15  ;;  %v862_v31 = vadd.f32 %v858_v62, %v1954_v44  ;;  %v2040_v6 = vmax.f32 %v851_v1, %v880_v9  ;;  %v878_v33 = vmul.f32 %v874_v22, %v1884_v54  ;;  %v890_v15 = vmul.f32 %v874_v22, %v874_v22 }
 0x19e   : > { %v625_v12 = vpop.f32.mrf.mxu0  ;;  %v2043_v56 = vmax.f32 %v1035_v39, 0.0  ;;  %v877_v11 = vmax.f32 %v873_v29, 0.0  ;;  %v1038_v53 = vadd.f32 %v1476_v42, %v1888_v60  ;;  %v705_v36 = vpop.f32.mrf.mxu1  ;;  %v896_v55 = vadd.f32 %v892_v21, %v863_v8 }
 0x19f   : > { %v871_v24 = vadd.f32 %v1878_v50, %v612_v63  ;;  %v1036_v41 = vadd.f32 %v1878_v50, %v692_v4  ;;  %v905_v43 = vadd.f32 %v1459_v23, %v1880_v51  ;;  %v2051_v1 = vmul.f32 %v2034_v2, %v1894_v5 }
 0x1a0   : > { %v1460_v44 = vpop.f32.mrf.mxu0  ;;  %v2053_v61 = vmax.f32 %v849_v32, %v878_v33  ;;  %v886_v62 = vadd.f32 %v874_v22, %v853_v19  ;;  %v881_v9 = vmul.f32 %v877_v11, %v1959_v47  ;;  %v894_v39 = vadd.f32 %v890_v15, %v861_v45  ;;  %v1480_v32 = vpop.f32.mrf.mxu1 }
 0x1a1   : > { %v893_v42 = vmul.f32 %v877_v11, %v877_v11  ;;  %v2056_v29 = vmax.f32 %v1038_v53, 0.0  ;;  %v875_v8 = vmax.f32 %v871_v24, 0.0  ;;  %v2060_v4 = vmul.f32 %v2043_v56, %v1884_v54 }
 0x1a2   : > { %v628_v63 = vpop.f32.mrf.mxu0  ;;  %v2062_v21 = vmax.f32 %v1036_v41, 0.0  ;;  %v909_v23 = vmax.f32 %v905_v43, 0.0  ;;  %v1070_v49 = vadd.f32 %v1479_v27, %v1880_v51  ;;  %v2067_v19 = vmul.f32 %v2043_v56, %v2043_v56 }
 0x1a3   : > { %2311 = vst [vmem:[#allocation20_spill] sm:$0xff] %v2056_v29  ;;  %v2069_v45 = vmax.f32 %v852_v17, %v881_v9  ;;  %v889_v15 = vadd.f32 %v877_v11, %v856_v46  ;;  %v879_v22 = vmul.f32 %v875_v8, %v1904_v14  ;;  %v897_v53 = vadd.f32 %v893_v42, %v864_v28  ;;  %v708_v42 = vpop.f32.mrf.mxu1 }
 0x1a4   : > { %2312 = vst [vmem:[#allocation21_spill] sm:$0xff] %v2062_v21  ;;  %2313 = vst [vmem:[#allocation22_spill] sm:$0xff] %v2067_v19  ;;  %v1463_v33 = vpop.f32.mrf.mxu0  ;;  %v2074_v24 = vmul.f32 %v2056_v29, %v1959_v47  ;;  %v887_v41 = vadd.f32 %v875_v8, %v854_v7  ;;  %v891_v43 = vmul.f32 %v875_v8, %v875_v8  ;;  %v2087_v28 = vmax.f32 %v1070_v49, 0.0 }
 0x1a5   : > { %v2076_v10 = vmax.f32 %v850_v3, %v879_v22  ;;  %v2080_v27 = vmul.f32 %v2062_v21, %v1904_v14  ;;  %v2084_v17 = vmul.f32 %v2062_v21, %v2062_v21  ;;  %v913_v11 = vmul.f32 %v909_v23, %v1894_v5 }
 0x1a6   : > { %v925_v46 = vmul.f32 %v909_v23, %v909_v23  ;;  %v903_v9 = vadd.f32 %v1882_v52, %v625_v12  ;;  %v1068_v7 = vadd.f32 %v1882_v52, %v705_v36  ;;  %v895_v3 = vadd.f32 %v891_v43, %v862_v31 }
 0x1a7   : > { %2314 = vst [vmem:[#allocation23_spill] sm:$0xff] %v2080_v27  ;;  %2315 = vst [vmem:[#allocation24_spill] sm:$0xff] %v2084_v17  ;;  %v921_v8 = vadd.f32 %v909_v23, %v888_v40  ;;  %v906_v22 = vadd.f32 %v1460_v44, %v1888_v60  ;;  %v1071_v19 = vadd.f32 %v1480_v32, %v1888_v60  ;;  %v641_v27 = vpop.f32.mrf.mxu0 }
 0x1a8   : > { %v917_v21 = vmax.f32 %v2040_v6, %v913_v11  ;;  %v907_v17 = vmax.f32 %v903_v9, 0.0  ;;  %v2094_v29 = vmax.f32 %v1068_v7, 0.0  ;;  %v904_v49 = vadd.f32 %v1878_v50, %v628_v63 }
 0x1a9   : > { %v910_v35 = vmax.f32 %v906_v22, 0.0  ;;  %v2097_v20 = vmax.f32 %v1071_v19, 0.0  ;;  %v1069_v12 = vadd.f32 %v1878_v50, %v708_v42  ;;  %v938_v31 = vadd.f32 %v1463_v33, %v1880_v51  ;;  %v1464_v43 = vpop.f32.mrf.mxu0 }
 0x1aa   : > { %v929_v40 = vadd.f32 %v925_v46, %v896_v55  ;;  %v2103_v36 = vmul.f32 %v2087_v28, %v1894_v5  ;;  %v911_v44 = vmul.f32 %v907_v17, %v1884_v54  ;;  %v923_v6 = vmul.f32 %v907_v17, %v907_v17 }
 0x1ab   : > { %2316 = vst [vmem:[#allocation25_spill] sm:$0xff] %v2097_v20  ;;  %v919_v23 = vadd.f32 %v907_v17, %v886_v62  ;;  %v2108_v32 = vmul.f32 %v2094_v29, %v1884_v54  ;;  %v914_v63 = vmul.f32 %v910_v35, %v1959_v47  ;;  %v926_v19 = vmul.f32 %v910_v35, %v910_v35 }
 0x1ac   : > { %v922_v11 = vadd.f32 %v910_v35, %v889_v15  ;;  %v2113_v51 = vmul.f32 %v2097_v20, %v1959_v47  ;;  %v908_v55 = vmax.f32 %v904_v49, 0.0  ;;  %v2115_v33 = vmax.f32 %v1069_v12, 0.0  ;;  %v644_v12 = vpop.f32.mrf.mxu0 }
 0x1ad   : > { %v915_v46 = vmax.f32 %v2053_v61, %v911_v44  ;;  %v927_v9 = vadd.f32 %v923_v6, %v894_v39  ;;  %v942_v62 = vmax.f32 %v938_v31, 0.0  ;;  %v936_v17 = vadd.f32 %v1882_v52, %v641_v27 }
 0x1ae   : > { %2317 = vst [vmem:[#allocation26_spill] sm:$0xff] %v2113_v51  ;;  %v918_v7 = vmax.f32 %v2069_v45, %v914_v63  ;;  %v2120_v42 = vadd.f32 %v926_v19, %v897_v53  ;;  %v912_v22 = vmul.f32 %v908_v55, %v1904_v14  ;;  %v924_v35 = vmul.f32 %v908_v55, %v908_v55 }
 0x1af   : > { %v920_v15 = vadd.f32 %v908_v55, %v887_v41  ;;  %v946_v20 = vmul.f32 %v942_v62, %v1894_v5  ;;  %v954_v51 = vadd.f32 %v942_v62, %v921_v8  ;;  %v940_v49 = vmax.f32 %v936_v17, 0.0 }
 0x1b0   : > { %v916_v38 = vmax.f32 %v2076_v10, %v912_v22  ;;  %v2127_v61 = vmul.f32 %v2115_v33, %v1904_v14  ;;  %v958_v52 = vmul.f32 %v942_v62, %v942_v62  ;;  %v939_v39 = vadd.f32 %v1464_v43, %v1888_v60 }
 0x1b1   : > { %v928_v45 = vadd.f32 %v924_v35, %v895_v3  ;;  %v950_v53 = vmax.f32 %v917_v21, %v946_v20  ;;  %v987_v27 = vadd.f32 %v1890_v0, %v954_v51  ;;  %v944_v41 = vmul.f32 %v940_v49, %v1884_v54 }
 0x1b2   : > { %v952_v31 = vadd.f32 %v940_v49, %v919_v23  ;;  %v956_v8 = vmul.f32 %v940_v49, %v940_v49  ;;  %v943_v44 = vmax.f32 %v939_v39, 0.0  ;;  %v937_v6 = vadd.f32 %v1878_v50, %v644_v12  ;;  %v2319_v39 = vld [vmem:[#allocation14_spill] sm:$0xff] }
 0x1b3   : > { %v983_v10 = vmax.f32 %v950_v53, %v1921_v26  ;;  %v948_v63 = vmax.f32 %v915_v46, %v944_v41  ;;  %v980_v19 = vmul.f32 %v1910_v18, %v1959_v47  ;;  %v1020_v60 = vadd.f32 %v1930_v34, %v987_v27  ;;  %v2322_v27 = vld [vmem:[#allocation12_spill] sm:$0xff] }
 0x1b4   : > { %v962_v20 = vadd.f32 %v958_v52, %v929_v40  ;;  %v985_v0 = vadd.f32 %v1902_v13, %v952_v31  ;;  %v947_v21 = vmul.f32 %v943_v44, %v1959_v47  ;;  %v955_v3 = vadd.f32 %v943_v44, %v922_v11 }
 0x1b5   : > { %v1016_v23 = vmax.f32 %v983_v10, %v1971_v58  ;;  %v960_v43 = vadd.f32 %v956_v8, %v927_v9  ;;  %v981_v50 = vmax.f32 %v948_v63, %v1936_v37  ;;  %v941_v26 = vmax.f32 %v937_v6, 0.0  ;;  %v2323_v31 = vld [vmem:[#allocation26_spill] sm:$0xff]  ;;  %v2325_v10 = vld [vmem:[#allocation20_spill] sm:$0xff] }
 0x1b6   : > { %v951_v51 = vmax.f32 %v918_v7, %v947_v21  ;;  %v959_v55 = vmul.f32 %v943_v44, %v943_v44  ;;  %v1053_v46 = vadd.f32 %v2034_v2, %v1020_v60  ;;  %v1018_v62 = vadd.f32 %v1973_v59, %v985_v0  ;;  %v2324_v44 = vld [vmem:[#allocation15_spill] sm:$0xff] }
 0x1b7   : > { %v1049_v34 = vmax.f32 %v1016_v23, %v2051_v1  ;;  %v1014_v13 = vmax.f32 %v981_v50, %v1997_v25  ;;  %v988_v40 = vadd.f32 %v1910_v18, %v955_v3  ;;  %v945_v58 = vmul.f32 %v941_v26, %v1904_v14  ;;  %v2327_v0 = vld [vmem:[#allocation19_spill] sm:$0xff]  ;;  %v2328_v3 = vld [vmem:[#allocation9_spill] sm:$0xff] }
 0x1b8   : > { %v984_v11 = vmax.f32 %v951_v51, %v980_v19  ;;  %v953_v9 = vadd.f32 %v941_v26, %v920_v15  ;;  %v957_v37 = vmul.f32 %v941_v26, %v941_v26  ;;  %v1086_v17 = vadd.f32 %v2087_v28, %v1053_v46  ;;  %v2326_v19 = vld [vmem:[#allocation23_spill] sm:$0xff]  ;;  %v2330_v26 = vld [vmem:[#allocation25_spill] sm:$0xff] }
 0x1b9   : > { %v1082_v7 = vmax.f32 %v1049_v34, %v2103_v36  ;;  %v1047_v22 = vmax.f32 %v1014_v13, %v2060_v4  ;;  %v949_v59 = vmax.f32 %v916_v38, %v945_v58  ;;  %v1051_v35 = vadd.f32 %v2043_v56, %v1018_v62  ;;  %v2318_v38 = vld [vmem:[#allocation10_spill] sm:$0xff]  ;;  %v2332_v34 = vld [vmem:[#allocation24_spill] sm:$0xff] }
 0x1ba   : > { %v1017_v1 = vmax.f32 %v984_v11, %v2015_v57  ;;  %v961_v49 = vadd.f32 %v957_v37, %v928_v45  ;;  %v986_v25 = vadd.f32 %v1928_v30, %v953_v9  ;;  %v1114_v18 = vmul.f32 %v1906_v16, %v1086_v17  ;;  %v2320_v45 = vld [vmem:[#allocation16_spill] sm:$0xff]  ;;  %v2321_v30 = vld [vmem:[#allocation18_spill] sm:$0xff]  ;;  %v2334_v9 = vld [vmem:[#allocation11_spill] sm:$0xff] }
 0x1bb   : > { %v1106_v12 = vmul.f32 %v1082_v7, %v1894_v5  ;;  %v1080_v15 = vmax.f32 %v1047_v22, %v2108_v32  ;;  %v982_v52 = vmax.f32 %v949_v59, %v1963_v48  ;;  %v1084_v36 = vadd.f32 %v2094_v29, %v1051_v35 }
 0x1bc   : > { %v1050_v4 = vmax.f32 %v1017_v1, %v2074_v24  ;;  %1120 = vadd.xlane.f32.xlu0 %v1114_v18  ;;  %v993_v56 = vadd.f32 %v2318_v38, %v960_v43  ;;  %v1021_v57 = vadd.f32 %v2319_v39, %v988_v40  ;;  %v1019_v53 = vadd.f32 %v2320_v45, %v986_v25  ;;  %v2329_v43 = vld [vmem:[#allocation22_spill] sm:$0xff]  ;;  %v2333_v40 = vld [vmem:[#allocation13_spill] sm:$0xff] }
 0x1bd   : > { %1110 = vst [vmem:[%s2165_s8 + $0x10] sm:$0xff] %v1106_v12  ;;  %v1104_v5 = vmul.f32 %v1080_v15, %v1884_v54  ;;  %v1015_v48 = vmax.f32 %v982_v52, %v2321_v30  ;;  %v1112_v32 = vmul.f32 %v1906_v16, %v1084_v36  ;;  %v994_v24 = vadd.f32 %v2322_v27, %v961_v49  ;;  %v2335_v1 = vld [vmem:[#allocation17_spill] sm:$0xff] }
 0x1be   : > { %v963_v41 = vadd.f32 %v959_v55, %v2120_v42  ;;  %v1083_v8 = vmax.f32 %v1050_v4, %v2323_v31  ;;  %v1026_v6 = vadd.f32 %v2324_v44, %v993_v56  ;;  %v1054_v63 = vadd.f32 %v2325_v10, %v1021_v57  ;;  %v2331_v55 = vld [vmem:[#allocation21_spill] sm:$0xff] }
 0x1bf   : > { %1108 = vst [vmem:[%s2165_s8] sm:$0xff] %v1104_v5  ;;  %v1048_v60 = vmax.f32 %v1015_v48, %v2326_v19  ;;  %1116 = vadd.xlane.f32.xlu1 %v1112_v32  ;;  %v1088_v54 = vmul.f32 %v2094_v29, %v2094_v29  ;;  %v1027_v21 = vadd.f32 %v2327_v0, %v994_v24 }
 0x1c0   : > { %v995_v23 = vadd.f32 %v2328_v3, %v962_v20  ;;  %v1107_v42 = vmul.f32 %v1083_v8, %v1959_v47  ;;  %v1059_v50 = vadd.f32 %v2329_v43, %v1026_v6  ;;  %v1087_v51 = vadd.f32 %v2330_v26, %v1054_v63 }
 0x1c1   : > { %v1052_v46 = vadd.f32 %v2331_v55, %v1019_v53  ;;  %v1081_v62 = vmax.f32 %v1048_v60, %v2127_v61  ;;  %v1060_v13 = vadd.f32 %v2332_v34, %v1027_v21  ;;  %v1089_v29 = vmul.f32 %v2115_v33, %v2115_v33 }
 0x1c2   : > { %v1028_v58 = vadd.f32 %v2333_v40, %v995_v23  ;;  %v1057_v20 = vmul.f32 %v2034_v2, %v2034_v2  ;;  %1111 = vst [vmem:[%s2165_s8 + $0x18] sm:$0xff] %v1107_v42  ;;  %v1092_v47 = vadd.f32 %v1088_v54, %v1059_v50  ;;  %v1115_v11 = vmul.f32 %v1906_v16, %v1087_v51 }
 0x1c3   : > { %v996_v37 = vadd.f32 %v2334_v9, %v963_v41  ;;  %v1058_v61 = vmul.f32 %v2325_v10, %v2325_v10  ;;  %v1105_v17 = vmul.f32 %v1081_v62, %v1904_v14  ;;  %v1093_v7 = vadd.f32 %v1089_v29, %v1060_v13 }
 0x1c4   : > { %v1129_v22 = vmul.f32 %v1906_v16, %v1092_v47  ;;  %1122 = vadd.xlane.f32.xlu1 %v1115_v11  ;;  %v1085_v59 = vadd.f32 %v2115_v33, %v1052_v46  ;;  %v1061_v35 = vadd.f32 %v1057_v20, %v1028_v58  ;;  %v1090_v25 = vmul.f32 %v2087_v28, %v2087_v28 }
 0x1c5   : > { %v1029_v2 = vadd.f32 %v2335_v1, %v996_v37  ;;  %1109 = vst [vmem:[%s2165_s8 + $0x8] sm:$0xff] %v1105_v17  ;;  %v1130_v49 = vmul.f32 %v1906_v16, %v1093_v7  ;;  %v1091_v18 = vmul.f32 %v2330_v26, %v2330_v26 }
 0x1c6   : > { %1133 = vadd.xlane.f32.xlu0 %v1129_v22  ;;  %v1113_v12 = vmul.f32 %v1906_v16, %v1085_v59  ;;  %v1094_v33 = vadd.f32 %v1090_v25, %v1061_v35 }
 0x1c7   : > { %v1062_v14 = vadd.f32 %v1058_v61, %v1029_v2 }
 0x1c8   : > { %1135 = vadd.xlane.f32.xlu1 %v1130_v49  ;;  %v1131_v36 = vmul.f32 %v1906_v16, %v1094_v33 }
 0x1c9   : > { %v1095_v15 = vadd.f32 %v1091_v18, %v1062_v14 }
 0x1ca   : > { %1118 = vadd.xlane.f32.xlu0 %v1113_v12 }
 0x1cb   : > { %v1132_v52 = vmul.f32 %v1906_v16, %v1095_v15 }
 0x1cd   : > { %1139 = vadd.xlane.f32.xlu1 %v1132_v52 }
 0x1ce   : > { %1137 = vadd.xlane.f32.xlu0 %v1131_v36 }
 0x1cf   : > { %1638 = shalt.err (!%p1635_p3)
}
 0x1d0   : > { %s1639_s27 = scalar_lea.hbm %s2215_s14, 512  ;;  %s1643_s8 = scalar_lea.hbm %s2286_s4, 1024 }
 0x1d1   : > { %p1640_p5 = scmp.ne.s32.totalorder %s2215_s14, %s1639_s27  ;;  %p1644_p9 = scmp.lt.s32.totalorder %s2215_s14, %s2286_s4 }
 0x1d2   : > { %p1645_p12 = scmp.lt.s32.totalorder %s1643_s8, %s1639_s27 }
 0x1d3   : > { %p1641_p6 = pnand %p1640_p5, %p1797_p4 }
 0x1d4   : > { %p1646_p10 = por %p1645_p12, %p1644_p9 }
 0x1d5   : > { %p1642_p7 = pneg %p1641_p6 }
 0x1d7   : > { %p1647_p11 = pnand %p1646_p10, %p1642_p7 }
 0x1d9   : > { %1650 = shalt.err (!%p1647_p11)
}
 0x1da   : > { %s1720_s12 = smov 128   ;;  %s1721_s17 = smov 8   ;;  %vm1124_vm8 = vcmask 7168  }
 0x1db   : > { %1501 = dma.vmem_to_hbm [thread:$0]  (%p1797_p4), %s2218_s15, 512, %s2215_s14, %s2222_s16, %s1720_s12, %s1720_s12, %s1721_s17  }
 0x1dc   : > { %s1400_s24 = sshll.u32 %s1835_s20, 5 }
 0x1dd   : > { %s328_s28 = scalar_lea.vmem %s2287_s5, %s1400_s24  ;;  %s337_s8 = scalar_lea.vmem %s2288_s6, %s1400_s24 }
 0x245   : > { %v1121_v16 = vpop.xlane.xlu0 %1120 }
 0x246   : > { %1127 = vst.msk [vmem:[%s328_s28 + $0x10] sm:$0xff] %vm1124_vm8, %v1121_v16 }
 0x248   : > { %v1117_v28 = vpop.xlane.xlu1 %1116 }
 0x249   : > { %1125 = vst.msk [vmem:[%s328_s28] sm:$0xff] %vm1124_vm8, %v1117_v28 }
 0x24d   : > { %v1123_v4 = vpop.xlane.xlu1 %1122 }
 0x24e   : > { %1128 = vst.msk [vmem:[%s328_s28 + $0x18] sm:$0xff] %vm1124_vm8, %v1123_v4 }
 0x24f   : > { %v1134_v38 = vpop.xlane.xlu0 %1133 }
 0x250   : > { %1141 = vst.msk [vmem:[%s337_s8] sm:$0xff] %vm1124_vm8, %v1134_v38 }
 0x251   : > { %v1136_v56 = vpop.xlane.xlu1 %1135 }
 0x252   : > { %1142 = vst.msk [vmem:[%s337_s8 + $0x8] sm:$0xff] %vm1124_vm8, %v1136_v56 }
 0x253   : > { %v1119_v39 = vpop.xlane.xlu0 %1118 }
 0x254   : > { %1126 = vst.msk [vmem:[%s328_s28 + $0x8] sm:$0xff] %vm1124_vm8, %v1119_v39 }
 0x256   : > { %v1140_v57 = vpop.xlane.xlu1 %1139 }
 0x257   : > { %1144 = vst.msk [vmem:[%s337_s8 + $0x18] sm:$0xff] %vm1124_vm8, %v1140_v57  ;;  %v1138_v45 = vpop.xlane.xlu0 %1137 }
 0x258   : > { %1143 = vst.msk [vmem:[%s337_s8 + $0x10] sm:$0xff] %vm1124_vm8, %v1138_v45 }
 0x259 PF: > { %p1513_p4 = scmp.ge.s32.totalorder %s1705_s26, 2  ;;  %s1199_s7 = sand.u32 1, %s1685_s21  }
 0x25a   : > { %s1200_s20 = scalar_lea.sflag [#allocation5], %s1199_s7 }
 0x25b   : > { %p1508_p13 = pnand %p1513_p4, %p1804_p8 }
 0x25d   : > { %p1509_p0 = pneg %p1508_p13 }
 0x25f   : > { %1680 = dma.done.wait (%p1509_p0), %s1200_s20, 512  }
 0x260   : > { %1682 = vsyncadd (%p1509_p0), %s1200_s20, 4294966784  ;;  %s21_s26 = sadd.s32 1, %s1705_s26   ;;  %s2336_s21 = smov %s1689_s22 }
 0x261   : > { %p18_p1 = scmp.ge.s32.totalorder %s21_s26, 4   ;;  %s2337_s22 = smov %s1693_s23 }
 0x262   : > { %s2338_s23 = smov %s1810_s10  ;;  %s2339_s24 = smov %s1701_s25 }
 0x263   : > { %s2340_s25 = smov %s2342_s29  ;;  %20 = sbr.rel (!%p18_p1) target bundleno = 5 (0x5), region = 108 }
 0x268   :  { %1229 = vsyncpa [#allocation4], 1 }
 0x269   :  { %1231 = vsyncpa [#allocation4 + $0x1], 1 }
 0x26a   :  { %1232 = vsyncpa [#allocation5], 1 }
 0x26b   :  { %1234 = vsyncpa [#allocation5 + $0x1], 1 }

</bundles_post_ra>
